<compile_context>
chip_gen: v6e
topology: v6e:2x2x1
jax: 0.10.0
libtpu: 0.0.40
codegen_flags: <defaults>
</compile_context>

<pallas_src>
import functools

import jax
import jax.numpy as jnp
from jax.experimental import pallas as pl
from jax.experimental.pallas import tpu as pltpu


def _channel_attn_kernel(x_ref, w1t_ref, w2t_ref, b2_ref, o_ref, *, hw_true):
    # x_ref:   (Bt, C, HWp)  block of batch elements (input dtype, lane-padded)
    # w1t_ref: (C, Cr)       first Linear weight, pre-transposed (no bias)
    # w2t_ref: (Cr, C)       second Linear weight, pre-transposed
    # b2_ref:  (1, C)        second Linear bias (row)
    # o_ref:   (Bt, C, HW)   unpadded output block
    x = x_ref[...]                                   # stay in input dtype
    bt = x.shape[0]
    hw_pad = x.shape[-1]

    # --- pooled statistics (only these are promoted to f32) ----------------
    # Avg pool: zero-padded lanes contribute 0 to the sum; divide by true HW.
    avg = jnp.sum(x, axis=-1, dtype=jnp.float32) * (1.0 / float(hw_true))  # (Bt, C)

    # Max pool: mask padded lanes to -inf (only generated when HW was padded).
    if hw_pad != hw_true:
        lane = jax.lax.broadcasted_iota(jnp.int32, (1, 1, hw_pad), 2)
        x_for_max = jnp.where(lane < hw_true, x, jnp.asarray(-jnp.inf, x.dtype))
    else:
        x_for_max = x
    mx = jnp.max(x_for_max, axis=-1).astype(jnp.float32)                   # (Bt, C)

    # --- fused shared MLP: one pass for both pooled vectors ----------------
    p = jnp.concatenate([avg, mx], axis=0)                                  # (2Bt, C)
    w1t = w1t_ref[...].astype(jnp.float32)                                  # (C, Cr)
    w2t = w2t_ref[...].astype(jnp.float32)                                  # (Cr, C)
    b2 = b2_ref[...].astype(jnp.float32)                                    # (1, C)

    h = jnp.maximum(jnp.dot(p, w1t, preferred_element_type=jnp.float32), 0.0)   # (2Bt, Cr)
    h2 = jnp.dot(h, w2t, preferred_element_type=jnp.float32) + b2               # (2Bt, C)

    att = jax.nn.sigmoid(h2[:bt] + h2[bt:])                                 # (Bt, C)

    # --- scale: elementwise multiply in the input dtype, store unpadded ----
    x_valid = x[:, :, :hw_true] if hw_pad != hw_true else x
    o_ref[...] = x_valid * att.astype(x.dtype)[:, :, None]


def channel_attention_modified(x, w1, w2, b2):
    """x: (B, C, H, W). Returns x * sigmoid(MLP(avgpool) + MLP(maxpool))."""
    B, C, H, W = x.shape
    HW = H * W
    Cr = w1.shape[0]

    # Lane-aligned last dimension for the INPUT only: pad HW up to a multiple
    # of 128 (zeros; max path masks them, avg path divides by the true HW).
    HWp = ((HW + 127) // 128) * 128
    x_flat = x.reshape(B, C, HW)
    if HWp != HW:
        x_flat = jnp.pad(x_flat, ((0, 0), (0, 0), (0, HWp - HW)))

    w1t = w1.T                 # (C, Cr)
    w2t = w2.T                 # (Cr, C)
    b2_row = b2.reshape(1, C)  # (1, C)

    # Batch-block size: biggest Bt under a conservative VMEM budget
    # (double-buffered in + out), while keeping >= 2 grid steps when B >= 2
    # so both v7x TensorCores / megacore get work.
    in_block_bytes = C * HWp * x.dtype.itemsize
    out_block_bytes = C * HW * x.dtype.itemsize
    vmem_budget = 24 * 1024 * 1024
    bt = max(1, min(B, vmem_budget // (2 * (in_block_bytes + out_block_bytes))))
    if B >= 2:
        bt = min(bt, (B + 1) // 2)
    while B % bt:              # keep blocks evenly dividing B
        bt -= 1
    grid = (B // bt,)

    # Scoped-VMEM request sized to the real working set (plus margin):
    # floor at the v6e default (32 MiB) so tiny cases never under-request,
    # cap at 64 MiB so we never exceed v7x physical VMEM.
    need = 2 * bt * (in_block_bytes + out_block_bytes) + 2 * 1024 * 1024
    vmem_limit = int(min(64 * 1024 * 1024, max(32 * 1024 * 1024, need)))

    kernel = functools.partial(_channel_attn_kernel, hw_true=HW)

    out_flat = pl.pallas_call(
        kernel,
        out_shape=jax.ShapeDtypeStruct((B, C, HW), x.dtype),
        grid_spec=pltpu.PrefetchScalarGridSpec(
            num_scalar_prefetch=0,
            grid=grid,
            in_specs=[
                pl.BlockSpec((bt, C, HWp), lambda b: (b, 0, 0)),
                pl.BlockSpec((C, Cr), lambda b: (0, 0)),
                pl.BlockSpec((Cr, C), lambda b: (0, 0)),
                pl.BlockSpec((1, C), lambda b: (0, 0)),
            ],
            out_specs=pl.BlockSpec((bt, C, HW), lambda b: (b, 0, 0)),
        ),
        compiler_params=pltpu.CompilerParams(
            dimension_semantics=("parallel",),
            vmem_limit_bytes=vmem_limit,
        ),
    )(x_flat, w1t, w2t, b2_row)

    return out_flat.reshape(B, C, H, W)


def _reference(x, w1, w2, b2):
    # Pure-JAX reference for correctness checking.
    avg = jnp.mean(x, axis=(2, 3))                         # (B, C)
    mx = jnp.max(x, axis=(2, 3))                           # (B, C)

    def mlp(v):                                            # (B, C)
        h = jnp.maximum(v @ w1.T, 0.0)                     # (B, Cr)
        return h @ w2.T + b2                               # (B, C)

    att = jax.nn.sigmoid(mlp(avg) + mlp(mx))               # (B, C)
    return x * att[:, :, None, None]


if __name__ == "__main__":
    def run_case(B, C, H, W, R, key):
        Cr = max(1, C // R)
        kx, k1, k2, kb = jax.random.split(key, 4)
        x = jax.random.normal(kx, (B, C, H, W), dtype=jnp.float32)
        # Deterministic parameter init (shapes match nn.Linear: (out, in)).
        w1 = jax.random.normal(k1, (Cr, C), dtype=jnp.float32) * (1.0 / jnp.sqrt(C))
        w2 = jax.random.normal(k2, (C, Cr), dtype=jnp.float32) * (1.0 / jnp.sqrt(Cr))
        b2 = jax.random.normal(kb, (C,), dtype=jnp.float32) * 0.01

        out = jax.block_until_ready(channel_attention_modified(x, w1, w2, b2))
        ref = _reference(x, w1, w2, b2)
        assert out.shape == (B, C, H, W)
        assert jnp.allclose(out, ref, atol=1e-5, rtol=1e-5), (
            f"mismatch vs reference for shape {(B, C, H, W)}")

    key = jax.random.PRNGKey(0)
    ka, kb = jax.random.split(key)
    # Module config: in_channels=64, reduction_ratio=16 -> hidden=4.
    run_case(2, 64, 16, 16, 16, ka)   # HW = 256: lane-aligned path (no padding)
    run_case(2, 64, 7, 7, 16, kb)     # HW = 49: padded input, unpadded output path

    print("KERNEL_OK")
</pallas_src>

<mosaic_0001>
module attributes {stable_mosaic.version = 11 : i64} {
  func.func @_channel_attn_kernel(%arg0: i32, %arg1: memref<1x64x256xf32, #tpu.memory_space<vmem>>, %arg2: memref<64x4xf32, #tpu.memory_space<vmem>>, %arg3: memref<4x64xf32, #tpu.memory_space<vmem>>, %arg4: memref<1x64xf32, #tpu.memory_space<vmem>>, %arg5: memref<1x64x256xf32, #tpu.memory_space<vmem>>) attributes {dimension_semantics = [#tpu.dimension_semantics<parallel>], iteration_bounds = array<i64: 2>, scalar_prefetch = 0 : i64, scratch_operands = 0 : i64, tpu.core_type = #tpu.core_type<tc>, window_params = [{transform_indices = @transform_0, window_bounds = array<i64: 1, 64, 256>}, {pipeline_mode = #tpu.pipeline_mode<synchronous>, transform_indices = @transform_1, window_bounds = array<i64: 64, 4>}, {pipeline_mode = #tpu.pipeline_mode<synchronous>, transform_indices = @transform_2, window_bounds = array<i64: 4, 64>}, {pipeline_mode = #tpu.pipeline_mode<synchronous>, transform_indices = @transform_3, window_bounds = array<i64: 1, 64>}, {transform_indices = @transform_4, window_bounds = array<i64: 1, 64, 256>}]} {
    %c0 = arith.constant 0 : index
    %c0_0 = arith.constant 0 : index
    %c0_1 = arith.constant 0 : index
    %0 = vector.load %arg1[%c0, %c0_0, %c0_1] : memref<1x64x256xf32, #tpu.memory_space<vmem>>, vector<1x64x256xf32>
    %cst = arith.constant dense<0.000000e+00> : vector<1x64xf32>
    %1 = vector.multi_reduction <add>, %0, %cst [2] : vector<1x64x256xf32> to vector<1x64xf32>
    %cst_2 = arith.constant 3.906250e-03 : f32
    %2 = vector.broadcast %cst_2 : f32 to vector<1x64xf32>
    %3 = arith.mulf %1, %2 : vector<1x64xf32>
    %cst_3 = arith.constant dense<0xFF800000> : vector<1x64xf32>
    %4 = vector.multi_reduction <maximumf>, %0, %cst_3 [2] : vector<1x64x256xf32> to vector<1x64xf32>
    %5 = tpu.concatenate %3, %4 in 0 : vector<1x64xf32>, vector<1x64xf32> -> vector<2x64xf32>
    %c0_4 = arith.constant 0 : index
    %c0_5 = arith.constant 0 : index
    %6 = vector.load %arg2[%c0_4, %c0_5] : memref<64x4xf32, #tpu.memory_space<vmem>>, vector<64x4xf32>
    %c0_6 = arith.constant 0 : index
    %c0_7 = arith.constant 0 : index
    %7 = vector.load %arg3[%c0_6, %c0_7] : memref<4x64xf32, #tpu.memory_space<vmem>>, vector<4x64xf32>
    %c0_8 = arith.constant 0 : index
    %c0_9 = arith.constant 0 : index
    %8 = vector.load %arg4[%c0_8, %c0_9] : memref<1x64xf32, #tpu.memory_space<vmem>>, vector<1x64xf32>
    %cst_10 = arith.constant dense<0.000000e+00> : vector<2x4xf32>
    %9 = tpu.matmul %5, %6, %cst_10 {dimension_numbers = #tpu.dot_dimension_numbers<[1], [0], [0], [1], [0, 0, 1, 1], [], []>} : vector<2x64xf32>, vector<64x4xf32>, vector<2x4xf32> -> vector<2x4xf32>
    %cst_11 = arith.constant 0.000000e+00 : f32
    %10 = vector.broadcast %cst_11 : f32 to vector<2x4xf32>
    %11 = arith.maximumf %9, %10 : vector<2x4xf32>
    %cst_12 = arith.constant dense<0.000000e+00> : vector<2x64xf32>
    %12 = tpu.matmul %11, %7, %cst_12 {dimension_numbers = #tpu.dot_dimension_numbers<[1], [0], [0], [1], [0, 0, 1, 1], [], []>} : vector<2x4xf32>, vector<4x64xf32>, vector<2x64xf32> -> vector<2x64xf32>
    %13 = vector.broadcast %8 : vector<1x64xf32> to vector<2x64xf32>
    %14 = arith.addf %12, %13 : vector<2x64xf32>
    %15 = vector.extract_strided_slice %14 {offsets = [0, 0], sizes = [1, 64], strides = [1, 1]} : vector<2x64xf32> to vector<1x64xf32>
    %16 = vector.extract_strided_slice %14 {offsets = [1, 0], sizes = [1, 64], strides = [1, 1]} : vector<2x64xf32> to vector<1x64xf32>
    %17 = arith.addf %15, %16 : vector<1x64xf32>
    %18 = arith.negf %17 : vector<1x64xf32>
    %19 = math.exp %18 : vector<1x64xf32>
    %cst_13 = arith.constant 1.000000e+00 : f32
    %20 = vector.broadcast %cst_13 : f32 to vector<1x64xf32>
    %21 = arith.addf %20, %19 : vector<1x64xf32>
    %22 = arith.divf %20, %21 : vector<1x64xf32>
    %23 = vector.shape_cast %22 : vector<1x64xf32> to vector<1x64x1xf32>
    %24 = vector.broadcast %23 : vector<1x64x1xf32> to vector<1x64x256xf32>
    %25 = arith.mulf %0, %24 : vector<1x64x256xf32>
    %c0_14 = arith.constant 0 : index
    %c0_15 = arith.constant 0 : index
    %c0_16 = arith.constant 0 : index
    %26 = vector.load %arg5[%c0_14, %c0_15, %c0_16] : memref<1x64x256xf32, #tpu.memory_space<vmem>>, vector<1x64x256xf32>
    tpu.vector_store %arg5[%c0_14, %c0_15, %c0_16], %25 {strides = array<i32>} : memref<1x64x256xf32, #tpu.memory_space<vmem>>, vector<1x64x256xf32>,
    return
  }
  func.func @transform_0(%arg0: i32) -> (i32, i32, i32) {
    %c0_i32 = arith.constant 0 : i32
    %c0_i32_0 = arith.constant 0 : i32
    %c0_i32_1 = arith.constant 0 : i32
    return %arg0, %c0_i32, %c0_i32_0 : i32, i32, i32
  }
  func.func @transform_1(%arg0: i32) -> (i32, i32) {
    %c0_i32 = arith.constant 0 : i32
    %c0_i32_0 = arith.constant 0 : i32
    %c0_i32_1 = arith.constant 0 : i32
    return %c0_i32, %c0_i32_0 : i32, i32
  }
  func.func @transform_2(%arg0: i32) -> (i32, i32) {
    %c0_i32 = arith.constant 0 : i32
    %c0_i32_0 = arith.constant 0 : i32
    %c0_i32_1 = arith.constant 0 : i32
    return %c0_i32, %c0_i32_0 : i32, i32
  }
  func.func @transform_3(%arg0: i32) -> (i32, i32) {
    %c0_i32 = arith.constant 0 : i32
    %c0_i32_0 = arith.constant 0 : i32
    %c0_i32_1 = arith.constant 0 : i32
    return %c0_i32, %c0_i32_0 : i32, i32
  }
  func.func @transform_4(%arg0: i32) -> (i32, i32, i32) {
    %c0_i32 = arith.constant 0 : i32
    %c0_i32_0 = arith.constant 0 : i32
    %c0_i32_1 = arith.constant 0 : i32
    return %arg0, %c0_i32, %c0_i32_0 : i32, i32, i32
  }
}

</mosaic_0001>

<bundles_post_ra>
// kernel: tpu_custom_call.1
= control target key start
LH: loop header
LB: loop body
LE: loop exit
PB: predicated region body
PF: predicated region fallthrough
CT: control target
= control target key end

     0   :  { %9 = vsyncpa [#allocation3], 0  ;;  %s1298_s0 = inlined_call_operand.hbm [shape: f32[2,64,256], index: 0, kind: input, shape index: {}]   ;;  %s1299_s1 = inlined_call_operand.vmem [shape: f32[64,4], index: 1, kind: input, shape index: {}]   ;;  %s1300_s2 = inlined_call_operand.vmem [shape: f32[4,64], index: 2, kind: input, shape index: {}]   ;;  %s1301_s3 = inlined_call_operand.vmem [shape: f32[1,64], index: 3, kind: input, shape index: {}]   ;;  %s1302_s4 = inlined_call_operand.hbm [shape: f32[2,64,256], index: 4, kind: output, shape index: {}]  }
   0x1   :  { %11 = vsyncpa [#allocation3 + $0x1], 0 }
   0x2   :  { %12 = vsyncpa [#allocation4], 0 }
   0x3   :  { %14 = vsyncpa [#allocation4 + $0x1], 0  ;;  %s974_s15 = smov 0   ;;  %s976_s16 = smov 0  }
   0x4   :  { %s978_s17 = smov 0   ;;  %s980_s18 = smov 0  }
   0x5 LB: > { %s995_s19 = sadd.s32 4294967295, %s939_s18   ;;  %s735_s20 = sadd.s32 4294967294, %s939_s18   ;;  %s939_s18 = sphi %s980_s18, %s1317_s18   ;;  %s935_s17 = sphi %s978_s17, %s1316_s17   ;;  %s931_s16 = sphi %s976_s16, %s1315_s16   ;;  %s927_s15 = sphi %s974_s15, %s1314_s15  }
   0x6   : > { %s999_s21 = sadd.s32 1, %s939_s18   ;;  %s27_s22 = sadd.s32 1, %s935_s17 }
   0x7   : > { %s24_s23 = ssub.s32 %s939_s18, %s999_s21  ;;  %p34_p0 = scmp.ne.s32.totalorder %s935_s17, %s931_s16 }
   0x8   : > { %p25_p1 = scmp.eq.s32.totalorder %s24_s23, 0  ;;  %p35_p2 = scmp.eq.s32.totalorder %s939_s18, 0 }
   0x9   : > { %p40_p3 = scmp.ne.s32.totalorder %s931_s16, %s927_s15  ;;  %p41_p4 = scmp.eq.s32.totalorder %s995_s19, 0 }
   0xa   : > { %s1011_s24 = scalar_select %p25_p1, %s935_s17, %s27_s22  }
   0xb   : > { %p1013_p5 = por %p35_p2, %p34_p0  ;;  %p1017_p6 = por %p41_p4, %p40_p3 }
   0xc   : > { %p127_p7 = scmp.eq.s32.totalorder %s995_s19, 1  ;;  %p133_p8 = scmp.eq.s32.totalorder %s735_s20, 1 }
   0xd   : > { %s1306_s26 = scalar_select %p1017_p6, 1, 0 }
   0xe   : > { %p803_p10 = scmp.lt.s32.totalorder %s939_s18, 2  ;;  %p1024_p11 = por %p127_p7, %p34_p0 }
   0xf   : > { %p1028_p12 = por %p133_p8, %p40_p3  ;;  %s162_s29 = sand.u32 1, %s935_s17  }
  0x10   : > { %s1307_s27 = scalar_select %p1024_p11, 1, 0 }
  0x11   : > { %s1308_s28 = scalar_select %p1028_p12, 1, 0 }
  0x12   : > { %s754_s30 = sshll.u32 %s939_s18, 11  ;;  %s738_s5 = sshll.u32 %s162_s29, 7 }
  0x13   : > { %s1037_s8 = scalar_lea.hbm %s1298_s0, %s754_s30  ;;  %s166_s9 = scalar_lea.vmem [#allocation2], %s738_s5 }
  0x14   : > { %s173_s10 = sshll.u32 %s166_s9, 4  ;;  %p1041_p13 = pnand %p803_p10, %p1013_p5  ;;  %s1045_s10 = int_to_ptr.vmem [resolvable:$true] %s173_s10 }
  0x15   : > { %s1047_s12 = scalar_lea.sflag [#allocation3], %s162_s29  ;;  %s847_s13 = scalar_lea.hbm %s1037_s8, 2048 }
  0x16   : > { %p848_p0 = scmp.ne.s32.totalorder %s1037_s8, %s847_s13  ;;  %p849_p1 = pneg %p1041_p13 }
  0x17   : > { %s852_s22 = scalar_lea.hbm %s1298_s0, 4096  ;;  %p853_p4 = scmp.lt.s32.totalorder %s1037_s8, %s1298_s0 }
  0x18   : > { %p850_p2 = pnand %p849_p1, %p848_p0  ;;  %p854_p5 = scmp.lt.s32.totalorder %s852_s22, %s847_s13 }
  0x1a   : > { %p851_p3 = pneg %p850_p2  ;;  %p855_p7 = por %p854_p5, %p853_p4 }
  0x1c   : > { %p856_p8 = pnand %p855_p7, %p851_p3 }
  0x1e   : > { %859 = shalt.err (!%p856_p8)
}
  0x1f   : > { %s860_s29 = scalar_lea.vmem %s1045_s10, 2048  ;;  %s941_s30 = smov [#allocation2]  }
  0x20   : > { %p861_p10 = scmp.ne.s32.totalorder %s1045_s10, %s860_s29  ;;  %s865_s5 = sshll.u32 %s941_s30, 4  ;;  %s866_s5 = int_to_ptr.vmem [resolvable:$false] %s865_s5 }
  0x21   : > { %s867_s6 = scalar_lea.vmem %s866_s5, 4096  ;;  %p868_p2 = scmp.lt.s32.totalorder %s1045_s10, %s866_s5 }
  0x22   : > { %p863_p9 = pnand %p861_p10, %p849_p1  ;;  %p869_p12 = scmp.lt.s32.totalorder %s867_s6, %s860_s29 }
  0x24   : > { %p864_p0 = pneg %p863_p9  ;;  %p870_p11 = por %p869_p12, %p868_p2 }
  0x26   : > { %p871_p6 = pnand %p870_p11, %p864_p0 }
  0x28   : > { %874 = shalt.err (!%p871_p6)
}
  0x29   : > { %s942_s7 = smov 256   ;;  %s943_s9 = smov 16  }
  0x2a   : > { %798 = dma.hbm_to_vmem [thread:$0]  (!%p1041_p13), %s1037_s8, 2048, %s1045_s10, %s1047_s12, %s942_s7, %s942_s7, %s943_s9  }
  0x2b   : > { %p741_p9 = scmp.ge.s32.totalorder %s939_s18, 1  ;;  %p181_p1 = scmp.lt.s32.totalorder %s939_s18, 3 }
  0x2d   : > { %p182_p3 = pnand %p741_p9, %p181_p1 }
  0x2e   : > { %s1071_s13 = sand.u32 (!%p182_p3), 1, %s931_s16   ;;  %p1310_p6 = scmp.ne.s32.totalorder (!%p182_p3), %s1306_s26, 0 }
  0x2f   : > { %185 = sbr.rel (%p182_p3) target bundleno = 803 (0x323), region = 36  ;;  %s742_s14 = sshll.u32 (!%p182_p3), %s1071_s13, 7 }
  0x30   : > { %s188_s20 = scalar_lea.sflag (!%p182_p3), [#allocation3], %s1071_s13  ;;  %s1077_s22 = scalar_lea.vmem (!%p182_p3), [#allocation2], %s742_s14 }
  0x34   : > { %918 = dma.done.wait (%p1310_p6), %s188_s20, 2048  }
  0x35   : > { %920 = vsyncadd (%p1310_p6), %s188_s20, 4294965248  ;;  %v1084_v0 = vld [vmem:[%s1077_s22 + $0x20] sm:$0xff]  ;;  %v1087_v1 = vld [vmem:[%s1077_s22 + $0x28] sm:$0xff]  ;;  %v944_v32 = vmov 0.0   ;;  %vm945_vm0 = vmmov 0   ;;  %v296_v44 = vlaneseq  ;;  %vm307_vm1 = vcmask 130112  }
  0x36   : > { %v1090_v2 = vld [vmem:[%s1077_s22] sm:$0xff]  ;;  %v238_v3 = vadd.f32 %v1087_v1, %v1084_v0  ;;  %v1095_v4 = vld [vmem:[%s1077_s22 + $0x8] sm:$0xff]  ;;  %v1098_v5 = vld [vmem:[%s1077_s22 + $0x30] sm:$0xff]  ;;  %v270_v16 = vmax.f32 %v1084_v0, %v1087_v1  ;;  %767 = vmatprep.subr.mxu0 %v944_v32  ;;  %786 = vmatprep.subr.mxu1 %v944_v32  ;;  %vm314_vm2 = vcmask 195712   ;;  %vm321_vm3 = vcmask 261312   ;;  %s1218_s23 = scalar_lea.vmem [#allocation5], %s742_s14 }
  0x37   : > { %v1101_v6 = vld [vmem:[%s1077_s22 + $0x38] sm:$0xff]  ;;  %v232_v7 = vadd.f32 %v1095_v4, %v1090_v2  ;;  %v1106_v8 = vld [vmem:[%s1077_s22 + $0x10] sm:$0xff]  ;;  %v264_v13 = vmax.f32 %v1090_v2, %v1095_v4  ;;  %v1120_v14 = vld [vmem:[%s1077_s22 + $0x40] sm:$0xff]  ;;  %783 = vmatprep.mubr.msk.f32.mxu0 %vm945_vm0, %v944_v32  ;;  %788 = vmatprep.mubr.msk.f32.mxu1 %vm945_vm0, %v944_v32  ;;  %v297_v47 = vand.u32 127, %v296_v44  ;;  %v1187_v51 = vshrl.u32 %v296_v44, 7  ;;  %s755_s14 = sshll.u32 %s995_s19, 11 }
  0x38   : > { %v1109_v9 = vld [vmem:[%s1077_s22 + $0x18] sm:$0xff]  ;;  %239 = vadd.xlane.f32.xlu1 %v238_v3  ;;  %v241_v10 = vadd.f32 %v1101_v6, %v1098_v5  ;;  %v1123_v15 = vld [vmem:[%s1077_s22 + $0x48] sm:$0xff]  ;;  %v1130_v18 = vld [vmem:[%s1077_s22 + $0x50] sm:$0xff]  ;;  %v273_v20 = vmax.f32 %v1098_v5, %v1101_v6  ;;  %vm328_vm4 = vcmask 326912   ;;  %vm335_vm5 = vcmask 392512   ;;  %s662_s25 = sshll.u32 %s1218_s23, 4  ;;  %s1249_s5 = scalar_lea.hbm %s1302_s4, %s755_s14  ;;  %s1251_s25 = int_to_ptr.vmem [resolvable:$true] %s662_s25 }
  0x39   : > { %233 = vadd.xlane.f32.xlu0 %v232_v7  ;;  %v235_v11 = vadd.f32 %v1109_v9, %v1106_v8  ;;  %v267_v12 = vmax.f32 %v1106_v8, %v1109_v9  ;;  %v244_v17 = vadd.f32 %v1123_v15, %v1120_v14  ;;  %v1133_v19 = vld [vmem:[%s1077_s22 + $0x58] sm:$0xff]  ;;  %v1140_v22 = vld [vmem:[%s1077_s22 + $0x60] sm:$0xff]  ;;  %v1143_v23 = vld [vmem:[%s1077_s22 + $0x68] sm:$0xff]  ;;  %v276_v24 = vmax.f32 %v1120_v14, %v1123_v15  ;;  %s649_s19 = scalar_lea.sflag [#allocation4], %s1071_s13  ;;  %s875_s6 = scalar_lea.vmem %s1251_s25, 2048 }
  0x3a   : > { %v247_v21 = vadd.f32 %v1133_v19, %v1130_v18  ;;  %v250_v25 = vadd.f32 %v1143_v23, %v1140_v22  ;;  %v1150_v26 = vld [vmem:[%s1077_s22 + $0x70] sm:$0xff]  ;;  %v1153_v27 = vld [vmem:[%s1077_s22 + $0x78] sm:$0xff]  ;;  %v279_v28 = vmax.f32 %v1130_v18, %v1133_v19  ;;  %v282_v31 = vmax.f32 %v1140_v22, %v1143_v23  ;;  %v407_v35 = vld [vmem:[%s1299_s1 + $0x28] sm:$0xff]  ;;  %p876_p11 = scmp.ne.s32.totalorder %s1251_s25, %s875_s6  ;;  %p1311_p12 = scmp.ne.s32.totalorder %s1307_s27, 0 }
  0x3b   : > { %v253_v29 = vadd.f32 %v1153_v27, %v1150_v26  ;;  %v285_v30 = vmax.f32 %v1150_v26, %v1153_v27  ;;  %v409_v33 = vld [vmem:[%s1299_s1 + $0x38] sm:$0xff]  ;;  %v408_v34 = vld [vmem:[%s1299_s1 + $0x30] sm:$0xff]  ;;  %v406_v36 = vld [vmem:[%s1299_s1 + $0x20] sm:$0xff]  ;;  %v302_v49 = vadd.s32 4294967288, %v297_v47  ;;  %v309_v55 = vadd.s32 4294967280, %v297_v47  ;;  %s946_s7 = smov [#allocation5]  }
  0x3c   : > { %242 = vadd.xlane.f32.xlu1 %v241_v10  ;;  %768 = vmatpush3.msra.mxu0 %v409_v33  ;;  %v405_v37 = vld [vmem:[%s1299_s1 + $0x18] sm:$0xff]  ;;  %v404_v38 = vld [vmem:[%s1299_s1 + $0x10] sm:$0xff]  ;;  %v403_v39 = vld [vmem:[%s1299_s1 + $0x8] sm:$0xff]  ;;  %v300_v57 = vsub.s32 %v297_v47, %v1187_v51  ;;  %v316_v59 = vadd.s32 4294967272, %v297_v47  ;;  %v323_v61 = vadd.s32 4294967264, %v297_v47  ;;  %v330_v62 = vadd.s32 4294967256, %v297_v47  ;;  %p877_p13 = pnand %p876_p11, %p1311_p12 }
  0x3d   : > { %236 = vadd.xlane.f32.xlu0 %v235_v11  ;;  %769 = vmatprep.subr.mxu0 %v944_v32  ;;  %v402_v40 = vld [vmem:[%s1299_s1] sm:$0xff]  ;;  %v305_v53 = vsub.s32 %v302_v49, %v1187_v51  ;;  %v312_v3 = vsub.s32 %v309_v55, %v1187_v51  ;;  %v337_v11 = vadd.s32 4294967248, %v297_v47  ;;  %vm342_vm6 = vcmask 458112   ;;  %s879_s9 = sshll.u32 %s946_s7, 4  ;;  %s880_s9 = int_to_ptr.vmem [resolvable:$false] %s879_s9 }
  0x3e   : > { %770 = vmatpush3.msra.mxu0 %v408_v34  ;;  %vm349_vm7 = vcmask 523712   ;;  %vm400_vm8 = vcmask 1040384   ;;  %vm412_vm9 = vcmask 523264   ;;  %vm497_vm10 = vcmask 1043456   ;;  %p878_p4 = pneg %p877_p13  ;;  %s881_s20 = scalar_lea.vmem %s880_s9, 4096 }
  0x3f   : > { %771 = vmatprep.subr.mxu0 %v944_v32  ;;  %v340_v34 = vsub.s32 %v337_v11, %v1187_v51  ;;  %v410_v11 = vld [vmem:[%s1300_s2] sm:$0xf]  ;;  %vm493_vm11 = vcmask 31744   ;;  %p882_p5 = scmp.lt.s32.totalorder %s1251_s25, %s880_s9  ;;  %p883_p7 = scmp.lt.s32.totalorder %s881_s20, %s875_s6 }
  0x40   : > { %268 = vmax.xlane.f32.xlu1 %v267_v12  ;;  %772 = vmatpush3.msra.mxu0 %v407_v35 }
  0x41   : > { %265 = vmax.xlane.f32.xlu0 %v264_v13  ;;  %773 = vmatprep.subr.mxu0 %v944_v32  ;;  %v319_v13 = vsub.s32 %v316_v59, %v1187_v51  ;;  %p884_p8 = por %p883_p7, %p882_p5 }
  0x42   : > { %774 = vmatpush3.msra.mxu0 %v406_v36  ;;  %787 = vmatpush3.msk.msra.mxu1 %vm497_vm10, %v410_v11 }
  0x43   : > { %775 = vmatprep.subr.mxu0 %v944_v32  ;;  %p885_p10 = pnand %p884_p8, %p878_p4 }
  0x44   : > { %271 = vmax.xlane.f32.xlu1 %v270_v16  ;;  %776 = vmatpush3.msra.mxu0 %v405_v37 }
  0x45   : > { %245 = vadd.xlane.f32.xlu0 %v244_v17  ;;  %777 = vmatprep.subr.mxu0 %v944_v32 }
  0x46   : > { %778 = vmatpush3.msra.mxu0 %v404_v38 }
  0x47   : > { %779 = vmatprep.subr.mxu0 %v944_v32 }
  0x48   : > { %274 = vmax.xlane.f32.xlu1 %v273_v20  ;;  %780 = vmatpush3.msra.mxu0 %v403_v39  ;;  %v344_v20 = vadd.s32 4294967240, %v297_v47 }
  0x49   : > { %248 = vadd.xlane.f32.xlu0 %v247_v21  ;;  %781 = vmatprep.subr.mxu0 %v944_v32  ;;  %v326_v21 = vsub.s32 %v323_v61, %v1187_v51 }
  0x4a   : > { %782 = vmatpush3.msra.mxu0 %v402_v40  ;;  %v347_v39 = vsub.s32 %v344_v20, %v1187_v51 }
  0x4c   : > { %277 = vmax.xlane.f32.xlu1 %v276_v24 }
  0x4d   : > { %251 = vadd.xlane.f32.xlu0 %v250_v25  ;;  %v333_v25 = vsub.s32 %v330_v62, %v1187_v51 }
  0x50   : > { %280 = vmax.xlane.f32.xlu1 %v279_v28 }
  0x51   : > { %254 = vadd.xlane.f32.xlu0 %v253_v29 }
  0x54   : > { %286 = vmax.xlane.f32.xlu1 %v285_v30 }
  0x55   : > { %283 = vmax.xlane.f32.xlu0 %v282_v31 }
  0xc1   : > { %v240_v41 = vpop.xlane.xlu1 %239 }
  0xc2   : > { %v234_v42 = vpop.xlane.xlu0 %233  ;;  %v258_v7 = vmul.f32 0.00390625, %v240_v41 }
  0xc3   : > { %v256_v58 = vmul.f32 0.00390625, %v234_v42 }
  0xc4   : > { %v313_v32 = vrot.slane %v258_v7, %v312_v3 }
  0xc5   : > { %v243_v43 = vpop.xlane.xlu1 %242  ;;  %v301_v12 = vrot.slane %v256_v58, %v300_v57 }
  0xc6   : > { %v237_v45 = vpop.xlane.xlu0 %236  ;;  %v259_v16 = vmul.f32 0.00390625, %v243_v43 }
  0xc7   : > { %v257_v54 = vmul.f32 0.00390625, %v237_v45 }
  0xc8   : > { %v320_v37 = vrot.slane %v259_v16, %v319_v13 }
  0xc9   : > { %v269_v46 = vpop.xlane.xlu1 %268  ;;  %v306_v63 = vrot.slane %v257_v54, %v305_v53 }
  0xca   : > { %v266_v48 = vpop.xlane.xlu0 %265  ;;  %v367_v29 = vrot.slane %v269_v46, %v305_v53 }
  0xcb   : > { %v308_v28 = vsel %vm307_vm1, %v306_v63, %v301_v12  ;;  %v363_v30 = vrot.slane %v266_v48, %v300_v57 }
  0xcc   : > { %v315_v41 = vsel %vm314_vm2, %v313_v32, %v308_v28  ;;  %v583_v32 = vsub.s32 0, %v1187_v51 }
  0xcd   : > { %v272_v50 = vpop.xlane.xlu1 %271  ;;  %v368_v45 = vsel %vm307_vm1, %v367_v29, %v363_v30 }
  0xce   : > { %v246_v52 = vpop.xlane.xlu0 %245  ;;  %v372_v33 = vrot.slane %v272_v50, %v312_v3 }
  0xcf   : > { %v260_v24 = vmul.f32 0.00390625, %v246_v52  ;;  %v322_v52 = vsel %vm321_vm3, %v320_v37, %v315_v41 }
  0xd0   : > { %v373_v48 = vsel %vm314_vm2, %v372_v33, %v368_v45 }
  0xd1   : > { %v275_v56 = vpop.xlane.xlu1 %274  ;;  %v327_v42 = vrot.slane %v260_v24, %v326_v21 }
  0xd2   : > { %v249_v60 = vpop.xlane.xlu0 %248  ;;  %v377_v38 = vrot.slane %v275_v56, %v319_v13 }
  0xd3   : > { %v261_v31 = vmul.f32 0.00390625, %v249_v60  ;;  %v329_v57 = vsel %vm328_vm4, %v327_v42, %v322_v52 }
  0xd4   : > { %v378_v53 = vsel %vm321_vm3, %v377_v38, %v373_v48 }
  0xd5   : > { %v278_v10 = vpop.xlane.xlu1 %277  ;;  %v334_v46 = vrot.slane %v261_v31, %v333_v25 }
  0xd6   : > { %v252_v17 = vpop.xlane.xlu0 %251  ;;  %v382_v43 = vrot.slane %v278_v10, %v326_v21 }
  0xd7   : > { %v262_v35 = vmul.f32 0.00390625, %v252_v17  ;;  %v336_v60 = vsel %vm335_vm5, %v334_v46, %v329_v57  ;;  %v745_v17 = vld [vmem:[%s1301_s3] ss:$0 sm:$0xff] }
  0xd8   : > { %v383_v58 = vsel %vm328_vm4, %v382_v43, %v378_v53 }
  0xd9   : > { %v281_v36 = vpop.xlane.xlu1 %280  ;;  %v341_v49 = vrot.slane %v262_v35, %v340_v34 }
  0xda   : > { %v255_v40 = vpop.xlane.xlu0 %254  ;;  %v387_v47 = vrot.slane %v281_v36, %v333_v25 }
  0xdb   : > { %v263_v44 = vmul.f32 0.00390625, %v255_v40  ;;  %v343_v62 = vsel %vm342_vm6, %v341_v49, %v336_v60 }
  0xdc   : > { %v388_v61 = vsel %vm335_vm5, %v387_v47, %v383_v58 }
  0xdd   : > { %v287_v50 = vpop.xlane.xlu1 %286  ;;  %v348_v54 = vrot.slane %v263_v44, %v347_v39 }
  0xde   : > { %v284_v55 = vpop.xlane.xlu0 %283  ;;  %v397_v56 = vrot.slane %v287_v50, %v347_v39 }
  0xdf   : > { %v392_v59 = vrot.slane %v284_v55, %v340_v34  ;;  %v350_v7 = vsel %vm349_vm7, %v348_v54, %v343_v62 }
  0xe1   : > { %v393_v63 = vsel %vm342_vm6, %v392_v59, %v388_v61 }
  0xe2   : > { %v398_v3 = vsel %vm349_vm7, %v397_v56, %v393_v63 }
  0xe3   : > { %v401_v10 = vsel %vm400_vm8, %v350_v7, %v398_v3 }
  0xe4   : > { %784 = vmatmul.mubr.msk.f32.vlgmr.msra.gmra.mxu0 %vm412_vm9, %v401_v10 }
 0x1a4   : > { %v482_v12 = vpop.f32.mrf.mxu0 }
 0x1a5   : > { %v486_v13 = vmax.f32 %v482_v12, 0.0 }
 0x1a6   : > { %v785_v16 = vpop.f32.mrf.mxu0 }
 0x1a7   : > { %789 = vmatmul.mubr.msk.f32.vlgmr.msra.gmra.mxu1 %vm493_vm11, %v486_v13 }
 0x267   : > { %v567_v20 = vpop.f32.mrf.mxu1 }
 0x268   : > { %v568_v21 = vadd.f32 %v745_v17, %v567_v20 }
 0x269   : > { %v790_v24 = vpop.f32.mrf.mxu1 }
 0x26a   : > { %v572_v25 = vrot.slane %v568_v21, 1 }
 0x26c   : > { %v574_v28 = vadd.f32 %v572_v25, %v568_v21 }
 0x26e   : > { %v748_v29 = vmul.f32 -1.442695, %v574_v28 }
 0x270   : > { %843 = vpow2.f32 %v748_v29 }
 0x27d   : > { %v844_v30 = vpop.eup %843 }
 0x27e   : > { %v578_v31 = vadd.f32 1.0, %v844_v30 }
 0x280   : > { %845 = vrcp.f32 %v578_v31 }
 0x28d   : > { %v846_v33 = vpop.eup %845 }
 0x28e   : > { %v584_v34 = vrot.slane %v846_v33, %v583_v32 }
 0x290   : > { %590 = vbcast.lane.b32.xlu1 %v584_v34, 264  ;;  %586 = vbcast.lane.b32.xlu0 %v584_v34, 256 }
 0x294   : > { %594 = vbcast.lane.b32.xlu1 %v584_v34, 272  ;;  %602 = vbcast.lane.b32.xlu0 %v584_v34, 288 }
 0x298   : > { %598 = vbcast.lane.b32.xlu1 %v584_v34, 280  ;;  %610 = vbcast.lane.b32.xlu0 %v584_v34, 304 }
 0x29c   : > { %606 = vbcast.lane.b32.xlu1 %v584_v34, 296 }
 0x2a0   : > { %614 = vbcast.lane.b32.xlu1 %v584_v34, 312 }
 0x302   : > { %v591_v35 = vpop.permute.xlu1 %590  ;;  %v587_v36 = vpop.permute.xlu0 %586 }
 0x303   : > { %v618_v37 = vmul.f32 %v591_v35, %v1106_v8  ;;  %v619_v38 = vmul.f32 %v591_v35, %v1109_v9  ;;  %v616_v39 = vmul.f32 %v587_v36, %v1090_v2  ;;  %v617_v51 = vmul.f32 %v587_v36, %v1095_v4 }
 0x305   : > { %634 = vst [vmem:[%s1218_s23 + $0x10] sm:$0xff] %v618_v37  ;;  %635 = vst [vmem:[%s1218_s23 + $0x18] sm:$0xff] %v619_v38 }
 0x306   : > { %632 = vst [vmem:[%s1218_s23] sm:$0xff] %v616_v39  ;;  %633 = vst [vmem:[%s1218_s23 + $0x8] sm:$0xff] %v617_v51  ;;  %v595_v8 = vpop.permute.xlu1 %594  ;;  %v603_v2 = vpop.permute.xlu0 %602 }
 0x307   : > { %v620_v4 = vmul.f32 %v595_v8, %v1084_v0  ;;  %v621_v9 = vmul.f32 %v595_v8, %v1087_v1  ;;  %v624_v40 = vmul.f32 %v603_v2, %v1120_v14  ;;  %v625_v41 = vmul.f32 %v603_v2, %v1123_v15 }
 0x309   : > { %636 = vst [vmem:[%s1218_s23 + $0x20] sm:$0xff] %v620_v4  ;;  %637 = vst [vmem:[%s1218_s23 + $0x28] sm:$0xff] %v621_v9 }
 0x30a   : > { %640 = vst [vmem:[%s1218_s23 + $0x40] sm:$0xff] %v624_v40  ;;  %641 = vst [vmem:[%s1218_s23 + $0x48] sm:$0xff] %v625_v41  ;;  %v599_v42 = vpop.permute.xlu1 %598  ;;  %v611_v43 = vpop.permute.xlu0 %610 }
 0x30b   : > { %v622_v0 = vmul.f32 %v599_v42, %v1098_v5  ;;  %v623_v44 = vmul.f32 %v599_v42, %v1101_v6  ;;  %v628_v1 = vmul.f32 %v611_v43, %v1140_v22  ;;  %v629_v14 = vmul.f32 %v611_v43, %v1143_v23 }
 0x30d   : > { %638 = vst [vmem:[%s1218_s23 + $0x30] sm:$0xff] %v622_v0  ;;  %639 = vst [vmem:[%s1218_s23 + $0x38] sm:$0xff] %v623_v44 }
 0x30e   : > { %644 = vst [vmem:[%s1218_s23 + $0x60] sm:$0xff] %v628_v1  ;;  %645 = vst [vmem:[%s1218_s23 + $0x68] sm:$0xff] %v629_v14  ;;  %v607_v15 = vpop.permute.xlu1 %606 }
 0x30f   : > { %v626_v45 = vmul.f32 %v607_v15, %v1130_v18  ;;  %v627_v46 = vmul.f32 %v607_v15, %v1133_v19 }
 0x311   : > { %642 = vst [vmem:[%s1218_s23 + $0x50] sm:$0xff] %v626_v45  ;;  %643 = vst [vmem:[%s1218_s23 + $0x58] sm:$0xff] %v627_v46 }
 0x312   : > { %v615_v5 = vpop.permute.xlu1 %614 }
 0x313   : > { %v630_v6 = vmul.f32 %v615_v5, %v1150_v26  ;;  %v631_v18 = vmul.f32 %v615_v5, %v1153_v27 }
 0x315   : > { %646 = vst [vmem:[%s1218_s23 + $0x70] sm:$0xff] %v630_v6  ;;  %647 = vst [vmem:[%s1218_s23 + $0x78] sm:$0xff] %v631_v18 }
 0x316   : > { %888 = shalt.err (!%p885_p10)
}
 0x317   : > { %s889_s22 = scalar_lea.hbm %s1249_s5, 2048  ;;  %s893_s10 = scalar_lea.hbm %s1302_s4, 4096 }
 0x318   : > { %p890_p0 = scmp.ne.s32.totalorder %s1249_s5, %s889_s22  ;;  %p894_p1 = scmp.lt.s32.totalorder %s1249_s5, %s1302_s4 }
 0x319   : > { %p895_p3 = scmp.lt.s32.totalorder %s893_s10, %s889_s22 }
 0x31a   : > { %p891_p2 = pnand %p890_p0, %p1311_p12 }
 0x31b   : > { %p896_p6 = por %p895_p3, %p894_p1 }
 0x31c   : > { %p892_p9 = pneg %p891_p2 }
 0x31e   : > { %p897_p11 = pnand %p896_p6, %p892_p9 }
 0x320   : > { %900 = shalt.err (!%p897_p11)
}
 0x321   : > { %s947_s23 = smov 256   ;;  %s948_s14 = smov 16  }
 0x322   : > { %793 = dma.vmem_to_hbm [thread:$0]  (%p1311_p12), %s1251_s25, 2048, %s1249_s5, %s649_s19, %s947_s23, %s947_s23, %s948_s14  }
 0x323 PF: > { %s677_s29 = sand.u32 1, %s927_s15   ;;  %p1312_p13 = scmp.ne.s32.totalorder %s1308_s28, 0 }
 0x324   : > { %p1313_p4 = scmp.ge.s32.totalorder %s939_s18, 2  ;;  %s678_s30 = scalar_lea.sflag [#allocation4], %s677_s29 }
 0x326   : > { %p800_p5 = pnand %p1313_p4, %p1312_p13 }
 0x328   : > { %p801_p7 = pneg %p800_p5 }
 0x32a   : > { %922 = dma.done.wait (%p801_p7), %s678_s30, 2048  }
 0x32b   : > { %924 = vsyncadd (%p801_p7), %s678_s30, 4294965248  ;;  %p17_p8 = scmp.ge.s32.totalorder %s999_s21, 4   ;;  %s1314_s15 = smov %s931_s16 }
 0x32c   : > { %s1315_s16 = smov %s935_s17  ;;  %s1316_s17 = smov %s1011_s24 }
 0x32d   : > { %s1317_s18 = smov %s999_s21  ;;  %19 = sbr.rel (!%p17_p8) target bundleno = 5 (0x5), region = 81 }
 0x332   :  { %683 = vsyncpa [#allocation3], 1 }
 0x333   :  { %685 = vsyncpa [#allocation3 + $0x1], 1 }
 0x334   :  { %686 = vsyncpa [#allocation4], 1 }
 0x335   :  { %688 = vsyncpa [#allocation4 + $0x1], 1 }

</bundles_post_ra>
